<compile_context>
chip_gen: v6e
topology: v6e:2x2x1
jax: 0.10.0
libtpu: 0.0.40
codegen_flags: <defaults>
</compile_context>

<pallas_src>
import functools

import jax
import jax.numpy as jnp
from jax import lax
from jax.experimental import pallas as pl
from jax.experimental.pallas import tpu as pltpu


def _round_up(a: int, b: int) -> int:
    return ((a + b - 1) // b) * b


def _time_embedding_kernel(x_ref, wpre_ref, bpre_ref, wfc_ref, bfc_ref,
                           g_ref, bt_ref, mmean_ref, ssum_ref, o_ref,
                           *, use_sin: bool, eps: float = 1e-5):
    # x_ref:     (TN, Fp)    rows tile of flattened input (Fp = F padded to 8)
    # wpre_ref:  (Fp, FT)    row i holds [periodic_w | linear_w] in segment i
    # bpre_ref:  (1, FT)     packed periodic/linear biases
    # wfc_ref:   (FT, FT)    block-diagonal fc weights (per-feature W^T blocks)
    # bfc_ref:   (1, FT)     packed fc biases
    # g_ref:     (1, FT)     LayerNorm gamma, pre-scaled by 1/F
    # bt_ref:    (1, FT)     LayerNorm beta,  pre-scaled by 1/F
    # mmean_ref: (FT, FT)    block-diagonal ones/T (segmented mean on MXU)
    # ssum_ref:  (FT, T)     stacked identities (segment sum over features)
    # o_ref:     (TN, T)     output tile, written exactly once
    TN, T = o_ref.shape
    FT = wfc_ref.shape[0]

    x_t = x_ref[...]                                            # (TN, Fp)

    # Packed pre-activation for all features: (TN, FT) in one skinny matmul.
    pre = jnp.dot(x_t, wpre_ref[...],
                  preferred_element_type=jnp.float32) + bpre_ref[...]

    # Last lane of each T-segment bypasses the periodic activation.
    col = lax.broadcasted_iota(jnp.int32, (TN, FT), 1)
    is_periodic = (col % T) != (T - 1)
    act = jnp.sin(pre) if use_sin else jnp.cos(pre)             # EUP, 128 lanes
    p = jnp.where(is_periodic, act, pre)

    # Block-diagonal Linear(T, T) for all features at once.
    h = jnp.dot(p, wfc_ref[...],
                preferred_element_type=jnp.float32) + bfc_ref[...]

    # Segmented LayerNorm stats on the MXU (mean/var broadcast per segment).
    mu = jnp.dot(h, mmean_ref[...], preferred_element_type=jnp.float32)
    c = h - mu
    var = jnp.dot(c * c, mmean_ref[...], preferred_element_type=jnp.float32)
    hn = c * lax.rsqrt(var + eps)
    hn = hn * g_ref[...] + bt_ref[...]                          # 1/F folded in
    r = jnp.maximum(hn, 0.0)                                    # ReLU (Dropout=id)

    # Feature mean = segment sum (1/F already folded) -> narrow (TN, T) output.
    o_ref[...] = jnp.dot(r, ssum_ref[...], preferred_element_type=jnp.float32)


def time_embedding_forward(x, params, *, use_sin: bool = True,
                           max_tile_rows: int = 2048):
    B, S, F = x.shape
    T = params["lin_wT"].shape[-1]
    N = B * S
    FT = F * T
    Fp = _round_up(F, 8)

    # N-tile size: multiple of 8 sublanes; force >= 2 grid steps when possible
    # so both TensorCores get work under dimension_semantics=("parallel",).
    n_rounded = _round_up(N, 8)
    tn = min(max_tile_rows, n_rounded)
    if n_rounded >= 16 and n_rounded // tn < 2:
        tn = _round_up((n_rounded + 1) // 2, 8)
    n_pad = _round_up(N, tn)

    x2 = x.reshape(N, F).astype(jnp.float32)
    x2 = jnp.pad(x2, ((0, n_pad - N), (0, Fp - F)))             # (n_pad, Fp)

    # ---- pack parameters in the wrapper (done once, outside the kernel) ----
    eye_fp = jnp.eye(Fp, F, dtype=jnp.float32)                  # (Fp, F)
    eye_f = jnp.eye(F, dtype=jnp.float32)                       # (F, F)

    # pre-activation weights: W_pre[i, i*T:(i+1)*T] = pl_w[i]
    w_pre = (eye_fp[:, :, None] * params["pl_w"][None, :, :]).reshape(Fp, FT)
    b_pre = params["pl_b"].reshape(1, FT)

    # block-diagonal fc weight: block (i,i) = lin_wT[i]  (layout: in -> out)
    w_fc = (eye_f[:, None, :, None]
            * params["lin_wT"][:, :, None, :]).reshape(FT, FT)
    b_fc = params["lin_b"].reshape(1, FT)

    # block-diagonal ones/T for segmented mean on the MXU
    m_mean = (eye_f[:, None, :, None]
              * jnp.full((1, T, 1, T), 1.0 / T, jnp.float32)).reshape(FT, FT)

    # stacked identities for the feature segment-sum
    s_sum = jnp.tile(jnp.eye(T, dtype=jnp.float32), (F, 1))     # (FT, T)

    # Fold the 1/F feature-mean into the LayerNorm affine (ReLU is positively
    # homogeneous), so the segment-sum at the end yields the feature mean.
    inv_f = jnp.float32(1.0 / F)
    g_flat = (params["ln_g"] * inv_f).reshape(1, FT)
    bt_flat = (params["ln_b"] * inv_f).reshape(1, FT)

    kernel = functools.partial(_time_embedding_kernel, use_sin=use_sin)

    out = pl.pallas_call(
        kernel,
        out_shape=jax.ShapeDtypeStruct((n_pad, T), jnp.float32),
        grid_spec=pltpu.PrefetchScalarGridSpec(
            num_scalar_prefetch=0,
            grid=(n_pad // tn,),
            in_specs=[
                pl.BlockSpec((tn, Fp), lambda n: (n, 0)),        # x rows tile
                pl.BlockSpec((Fp, FT), lambda n: (0, 0)),        # packed pre W
                pl.BlockSpec((1, FT), lambda n: (0, 0)),         # packed pre b
                pl.BlockSpec((FT, FT), lambda n: (0, 0)),        # block-diag fc W
                pl.BlockSpec((1, FT), lambda n: (0, 0)),         # fc bias
                pl.BlockSpec((1, FT), lambda n: (0, 0)),         # LN gamma / F
                pl.BlockSpec((1, FT), lambda n: (0, 0)),         # LN beta  / F
                pl.BlockSpec((FT, FT), lambda n: (0, 0)),        # mean matrix
                pl.BlockSpec((FT, T), lambda n: (0, 0)),         # segment-sum
            ],
            out_specs=pl.BlockSpec((tn, T), lambda n: (n, 0)),
        ),
        compiler_params=pltpu.CompilerParams(
            dimension_semantics=("parallel",),                   # megacore
            vmem_limit_bytes=32 * 1024 * 1024,
        ),
    )(x2, w_pre, b_pre, w_fc, b_fc, g_flat, bt_flat, m_mean, s_sum)

    return out[:N].reshape(B, S, T)


def init_params(key, num_features, time_features):
    """Deterministic synthetic init mirroring the PyTorch __init__ shapes."""
    T = time_features
    ks = jax.random.split(key, 6)

    # PeriodicActivation: xavier_uniform for weights, randn-like biases.
    bw = (6.0 / (1 + (T - 1))) ** 0.5
    periodic_w = jax.random.uniform(ks[0], (num_features, T - 1),
                                    minval=-bw, maxval=bw, dtype=jnp.float32)
    periodic_b = jax.random.normal(ks[1], (num_features, T - 1), dtype=jnp.float32)
    blin = (6.0 / 2.0) ** 0.5
    linear_w = jax.random.uniform(ks[2], (num_features, 1),
                                  minval=-blin, maxval=blin, dtype=jnp.float32)
    linear_b = jax.random.normal(ks[3], (num_features, 1), dtype=jnp.float32)

    pl_w = jnp.concatenate([periodic_w, linear_w], axis=1)     # (F, T)
    pl_b = jnp.concatenate([periodic_b, linear_b], axis=1)     # (F, T)

    # nn.Linear(T, T) default init U(-1/sqrt(T), 1/sqrt(T)); stored transposed.
    bl = 1.0 / (T ** 0.5)
    lin_wT = jax.random.uniform(ks[4], (num_features, T, T),
                                minval=-bl, maxval=bl, dtype=jnp.float32)
    lin_b = jax.random.uniform(ks[5], (num_features, T),
                               minval=-bl, maxval=bl, dtype=jnp.float32)

    ln_g = jnp.ones((num_features, T), jnp.float32)
    ln_b = jnp.zeros((num_features, T), jnp.float32)

    return dict(pl_w=pl_w, pl_b=pl_b, lin_wT=lin_wT, lin_b=lin_b,
                ln_g=ln_g, ln_b=ln_b)


def reference_forward(x, params, *, use_sin: bool = True, eps: float = 1e-5):
    """Pure-JAX reference matching the PyTorch forward (eval mode)."""
    B, S, F = x.shape
    T = params["lin_wT"].shape[-1]
    outs = []
    for i in range(F):
        t = x[:, :, i].reshape(-1, 1).astype(jnp.float32)
        w = params["pl_w"][i]
        b = params["pl_b"][i]
        pre = t * w[None, :] + b[None, :]
        act = jnp.sin(pre) if use_sin else jnp.cos(pre)
        p = jnp.concatenate([act[:, :T - 1], pre[:, T - 1:]], axis=1)
        h = p @ params["lin_wT"][i] + params["lin_b"][i][None, :]
        mu = h.mean(-1, keepdims=True)
        var = ((h - mu) ** 2).mean(-1, keepdims=True)
        hn = (h - mu) / jnp.sqrt(var + eps)
        hn = hn * params["ln_g"][i] + params["ln_b"][i]
        outs.append(jnp.maximum(hn, 0.0).reshape(B, S, T))
    return jnp.mean(jnp.stack(outs, axis=-1), axis=-1)


if __name__ == "__main__":
    # Small shapes: batch=2, seq=9, temporal variables F=4, time_features T=32.
    # seq=9 (N=18) deliberately exercises N padding; max_tile_rows=8 forces a
    # multi-step, tiled grid even at these tiny sizes.
    B, S, F, T = 2, 9, 4, 32
    key = jax.random.PRNGKey(0)
    kx, kp = jax.random.split(key)

    x = jax.random.normal(kx, (B, S, F), dtype=jnp.float32)
    params = init_params(kp, F, T)

    out = time_embedding_forward(x, params, use_sin=True, max_tile_rows=8)
    out = jax.block_until_ready(out)

    ref = reference_forward(x, params, use_sin=True)
    assert out.shape == (B, S, T)
    assert jnp.allclose(out, ref, atol=1e-4, rtol=1e-4), "mismatch vs reference"

    print("KERNEL_OK")
</pallas_src>

<mosaic_0001>
module attributes {stable_mosaic.version = 11 : i64} {
  func.func @_time_embedding_kernel(%arg0: i32, %arg1: memref<8x8xf32, #tpu.memory_space<vmem>>, %arg2: memref<8x128xf32, #tpu.memory_space<vmem>>, %arg3: memref<1x128xf32, #tpu.memory_space<vmem>>, %arg4: memref<128x128xf32, #tpu.memory_space<vmem>>, %arg5: memref<1x128xf32, #tpu.memory_space<vmem>>, %arg6: memref<1x128xf32, #tpu.memory_space<vmem>>, %arg7: memref<1x128xf32, #tpu.memory_space<vmem>>, %arg8: memref<128x128xf32, #tpu.memory_space<vmem>>, %arg9: memref<128x32xf32, #tpu.memory_space<vmem>>, %arg10: memref<8x32xf32, #tpu.memory_space<vmem>>) attributes {dimension_semantics = [#tpu.dimension_semantics<parallel>], iteration_bounds = array<i64: 3>, scalar_prefetch = 0 : i64, scratch_operands = 0 : i64, tpu.core_type = #tpu.core_type<tc>, window_params = [{transform_indices = @transform_0, window_bounds = array<i64: 8, 8>}, {pipeline_mode = #tpu.pipeline_mode<synchronous>, transform_indices = @transform_1, window_bounds = array<i64: 8, 128>}, {pipeline_mode = #tpu.pipeline_mode<synchronous>, transform_indices = @transform_2, window_bounds = array<i64: 1, 128>}, {pipeline_mode = #tpu.pipeline_mode<synchronous>, transform_indices = @transform_3, window_bounds = array<i64: 128, 128>}, {pipeline_mode = #tpu.pipeline_mode<synchronous>, transform_indices = @transform_4, window_bounds = array<i64: 1, 128>}, {pipeline_mode = #tpu.pipeline_mode<synchronous>, transform_indices = @transform_5, window_bounds = array<i64: 1, 128>}, {pipeline_mode = #tpu.pipeline_mode<synchronous>, transform_indices = @transform_6, window_bounds = array<i64: 1, 128>}, {pipeline_mode = #tpu.pipeline_mode<synchronous>, transform_indices = @transform_7, window_bounds = array<i64: 128, 128>}, {pipeline_mode = #tpu.pipeline_mode<synchronous>, transform_indices = @transform_8, window_bounds = array<i64: 128, 32>}, {transform_indices = @transform_9, window_bounds = array<i64: 8, 32>}]} {
    %c0 = arith.constant 0 : index
    %c0_0 = arith.constant 0 : index
    %0 = vector.load %arg1[%c0, %c0_0] : memref<8x8xf32, #tpu.memory_space<vmem>>, vector<8x8xf32>
    %c0_1 = arith.constant 0 : index
    %c0_2 = arith.constant 0 : index
    %1 = vector.load %arg2[%c0_1, %c0_2] : memref<8x128xf32, #tpu.memory_space<vmem>>, vector<8x128xf32>
    %cst = arith.constant dense<0.000000e+00> : vector<8x128xf32>
    %2 = tpu.matmul %0, %1, %cst {dimension_numbers = #tpu.dot_dimension_numbers<[1], [0], [0], [1], [0, 0, 1, 1], [], []>} : vector<8x8xf32>, vector<8x128xf32>, vector<8x128xf32> -> vector<8x128xf32>
    %c0_3 = arith.constant 0 : index
    %c0_4 = arith.constant 0 : index
    %3 = vector.load %arg3[%c0_3, %c0_4] : memref<1x128xf32, #tpu.memory_space<vmem>>, vector<1x128xf32>
    %4 = vector.broadcast %3 : vector<1x128xf32> to vector<8x128xf32>
    %5 = arith.addf %2, %4 : vector<8x128xf32>
    %6 = tpu.iota {dimensions = array<i32: 1>} : vector<8x128xi32>
    %c32_i32 = arith.constant 32 : i32
    %c0_i32 = arith.constant 0 : i32
    %7 = arith.cmpi eq, %c32_i32, %c0_i32 : i32
    %c1_i32 = arith.constant 1 : i32
    %8 = arith.select %7, %c1_i32, %c32_i32 : i32
    %9 = vector.broadcast %8 : i32 to vector<8x128xi32>
    %10 = arith.remsi %6, %9 : vector<8x128xi32>
    %c0_i32_5 = arith.constant 0 : i32
    %11 = vector.broadcast %c0_i32_5 : i32 to vector<8x128xi32>
    %12 = arith.cmpi ne, %10, %11 : vector<8x128xi32>
    %c0_i32_6 = arith.constant 0 : i32
    %13 = vector.broadcast %c0_i32_6 : i32 to vector<8x128xi32>
    %14 = arith.cmpi slt, %10, %13 : vector<8x128xi32>
    %c0_i32_7 = arith.constant 0 : i32
    %15 = arith.cmpi slt, %8, %c0_i32_7 : i32
    %16 = vector.broadcast %15 : i1 to vector<8x128xi1>
    %17 = vector.broadcast %16 : vector<8x128xi1> to vector<8x128xi1>
    %18 = arith.xori %14, %17 : vector<8x128xi1>
    %19 = arith.andi %18, %12 : vector<8x128xi1>
    %20 = vector.broadcast %8 : i32 to vector<8x128xi32>
    %21 = arith.addi %10, %20 : vector<8x128xi32>
    %22 = arith.select %19, %21, %10 : vector<8x128xi1>, vector<8x128xi32>
    %c31_i32 = arith.constant 31 : i32
    %23 = vector.broadcast %c31_i32 : i32 to vector<8x128xi32>
    %24 = arith.cmpi ne, %22, %23 : vector<8x128xi32>
    %25 = math.sin %5 : vector<8x128xf32>
    %26 = arith.select %24, %25, %5 : vector<8x128xi1>, vector<8x128xf32>
    %c0_8 = arith.constant 0 : index
    %c0_9 = arith.constant 0 : index
    %27 = vector.load %arg4[%c0_8, %c0_9] : memref<128x128xf32, #tpu.memory_space<vmem>>, vector<128x128xf32>
    %cst_10 = arith.constant dense<0.000000e+00> : vector<8x128xf32>
    %28 = tpu.matmul %26, %27, %cst_10 {dimension_numbers = #tpu.dot_dimension_numbers<[1], [0], [0], [1], [0, 0, 1, 1], [], []>} : vector<8x128xf32>, vector<128x128xf32>, vector<8x128xf32> -> vector<8x128xf32>
    %c0_11 = arith.constant 0 : index
    %c0_12 = arith.constant 0 : index
    %29 = vector.load %arg5[%c0_11, %c0_12] : memref<1x128xf32, #tpu.memory_space<vmem>>, vector<1x128xf32>
    %30 = vector.broadcast %29 : vector<1x128xf32> to vector<8x128xf32>
    %31 = arith.addf %28, %30 : vector<8x128xf32>
    %c0_13 = arith.constant 0 : index
    %c0_14 = arith.constant 0 : index
    %32 = vector.load %arg8[%c0_13, %c0_14] : memref<128x128xf32, #tpu.memory_space<vmem>>, vector<128x128xf32>
    %cst_15 = arith.constant dense<0.000000e+00> : vector<8x128xf32>
    %33 = tpu.matmul %31, %32, %cst_15 {dimension_numbers = #tpu.dot_dimension_numbers<[1], [0], [0], [1], [0, 0, 1, 1], [], []>} : vector<8x128xf32>, vector<128x128xf32>, vector<8x128xf32> -> vector<8x128xf32>
    %34 = arith.subf %31, %33 : vector<8x128xf32>
    %35 = arith.mulf %34, %34 : vector<8x128xf32>
    %c0_16 = arith.constant 0 : index
    %c0_17 = arith.constant 0 : index
    %36 = vector.load %arg8[%c0_16, %c0_17] : memref<128x128xf32, #tpu.memory_space<vmem>>, vector<128x128xf32>
    %cst_18 = arith.constant dense<0.000000e+00> : vector<8x128xf32>
    %37 = tpu.matmul %35, %36, %cst_18 {dimension_numbers = #tpu.dot_dimension_numbers<[1], [0], [0], [1], [0, 0, 1, 1], [], []>} : vector<8x128xf32>, vector<128x128xf32>, vector<8x128xf32> -> vector<8x128xf32>
    %cst_19 = arith.constant 9.99999974E-6 : f32
    %38 = vector.broadcast %cst_19 : f32 to vector<8x128xf32>
    %39 = arith.addf %37, %38 : vector<8x128xf32>
    %40 = math.rsqrt %39 : vector<8x128xf32>
    %41 = arith.mulf %34, %40 : vector<8x128xf32>
    %c0_20 = arith.constant 0 : index
    %c0_21 = arith.constant 0 : index
    %42 = vector.load %arg6[%c0_20, %c0_21] : memref<1x128xf32, #tpu.memory_space<vmem>>, vector<1x128xf32>
    %43 = vector.broadcast %42 : vector<1x128xf32> to vector<8x128xf32>
    %44 = arith.mulf %41, %43 : vector<8x128xf32>
    %c0_22 = arith.constant 0 : index
    %c0_23 = arith.constant 0 : index
    %45 = vector.load %arg7[%c0_22, %c0_23] : memref<1x128xf32, #tpu.memory_space<vmem>>, vector<1x128xf32>
    %46 = vector.broadcast %45 : vector<1x128xf32> to vector<8x128xf32>
    %47 = arith.addf %44, %46 : vector<8x128xf32>
    %cst_24 = arith.constant 0.000000e+00 : f32
    %48 = vector.broadcast %cst_24 : f32 to vector<8x128xf32>
    %49 = arith.maximumf %47, %48 : vector<8x128xf32>
    %c0_25 = arith.constant 0 : index
    %c0_26 = arith.constant 0 : index
    %50 = vector.load %arg9[%c0_25, %c0_26] : memref<128x32xf32, #tpu.memory_space<vmem>>, vector<128x32xf32>
    %cst_27 = arith.constant dense<0.000000e+00> : vector<8x32xf32>
    %51 = tpu.matmul %49, %50, %cst_27 {dimension_numbers = #tpu.dot_dimension_numbers<[1], [0], [0], [1], [0, 0, 1, 1], [], []>} : vector<8x128xf32>, vector<128x32xf32>, vector<8x32xf32> -> vector<8x32xf32>
    %c0_28 = arith.constant 0 : index
    %c0_29 = arith.constant 0 : index
    %52 = vector.load %arg10[%c0_28, %c0_29] : memref<8x32xf32, #tpu.memory_space<vmem>>, vector<8x32xf32>
    tpu.vector_store %arg10[%c0_28, %c0_29], %51 {strides = array<i32>} : memref<8x32xf32, #tpu.memory_space<vmem>>, vector<8x32xf32>,
    return
  }
  func.func @transform_0(%arg0: i32) -> (i32, i32) {
    %c0_i32 = arith.constant 0 : i32
    %c0_i32_0 = arith.constant 0 : i32
    return %arg0, %c0_i32 : i32, i32
  }
  func.func @transform_1(%arg0: i32) -> (i32, i32) {
    %c0_i32 = arith.constant 0 : i32
    %c0_i32_0 = arith.constant 0 : i32
    %c0_i32_1 = arith.constant 0 : i32
    return %c0_i32, %c0_i32_0 : i32, i32
  }
  func.func @transform_2(%arg0: i32) -> (i32, i32) {
    %c0_i32 = arith.constant 0 : i32
    %c0_i32_0 = arith.constant 0 : i32
    %c0_i32_1 = arith.constant 0 : i32
    return %c0_i32, %c0_i32_0 : i32, i32
  }
  func.func @transform_3(%arg0: i32) -> (i32, i32) {
    %c0_i32 = arith.constant 0 : i32
    %c0_i32_0 = arith.constant 0 : i32
    %c0_i32_1 = arith.constant 0 : i32
    return %c0_i32, %c0_i32_0 : i32, i32
  }
  func.func @transform_4(%arg0: i32) -> (i32, i32) {
    %c0_i32 = arith.constant 0 : i32
    %c0_i32_0 = arith.constant 0 : i32
    %c0_i32_1 = arith.constant 0 : i32
    return %c0_i32, %c0_i32_0 : i32, i32
  }
  func.func @transform_5(%arg0: i32) -> (i32, i32) {
    %c0_i32 = arith.constant 0 : i32
    %c0_i32_0 = arith.constant 0 : i32
    %c0_i32_1 = arith.constant 0 : i32
    return %c0_i32, %c0_i32_0 : i32, i32
  }
  func.func @transform_6(%arg0: i32) -> (i32, i32) {
    %c0_i32 = arith.constant 0 : i32
    %c0_i32_0 = arith.constant 0 : i32
    %c0_i32_1 = arith.constant 0 : i32
    return %c0_i32, %c0_i32_0 : i32, i32
  }
  func.func @transform_7(%arg0: i32) -> (i32, i32) {
    %c0_i32 = arith.constant 0 : i32
    %c0_i32_0 = arith.constant 0 : i32
    %c0_i32_1 = arith.constant 0 : i32
    return %c0_i32, %c0_i32_0 : i32, i32
  }
  func.func @transform_8(%arg0: i32) -> (i32, i32) {
    %c0_i32 = arith.constant 0 : i32
    %c0_i32_0 = arith.constant 0 : i32
    %c0_i32_1 = arith.constant 0 : i32
    return %c0_i32, %c0_i32_0 : i32, i32
  }
  func.func @transform_9(%arg0: i32) -> (i32, i32) {
    %c0_i32 = arith.constant 0 : i32
    %c0_i32_0 = arith.constant 0 : i32
    return %arg0, %c0_i32 : i32, i32
  }
}

</mosaic_0001>

<bundles_post_ra>
// kernel: tpu_custom_call.1
= control target key start
LH: loop header
LB: loop body
LE: loop exit
PB: predicated region body
PF: predicated region fallthrough
CT: control target
= control target key end

     0   :  { %14 = vsyncpa [#allocation3], 0  ;;  %s1830_s0 = inlined_call_operand.vmem [shape: f32[24,8], index: 0, kind: input, shape index: {}]   ;;  %s1831_s1 = inlined_call_operand.vmem [shape: f32[8,128], index: 1, kind: input, shape index: {}]   ;;  %s1832_s2 = inlined_call_operand.vmem [shape: f32[1,128], index: 2, kind: input, shape index: {}]   ;;  %s1833_s3 = inlined_call_operand.vmem [shape: f32[128,128], index: 3, kind: input, shape index: {}]   ;;  %s1834_s4 = inlined_call_operand.vmem [shape: f32[1,128], index: 4, kind: input, shape index: {}]   ;;  %s1835_s5 = inlined_call_operand.vmem [shape: f32[1,128], index: 5, kind: input, shape index: {}]   ;;  %s1836_s6 = inlined_call_operand.vmem [shape: f32[1,128], index: 6, kind: input, shape index: {}]   ;;  %s1837_s7 = inlined_call_operand.hbm [shape: f32[128,128], index: 7, kind: input, shape index: {}]   ;;  %s1838_s8 = inlined_call_operand.vmem [shape: f32[128,32], index: 8, kind: input, shape index: {}]   ;;  %s1839_s9 = inlined_call_operand.hbm [shape: f32[24,32], index: 9, kind: output, shape index: {}]  }
   0x1   :  { %15 = vsyncpa [#allocation4], 0 }
   0x2   :  { %17 = vsyncpa [#allocation4 + $0x1], 0  ;;  %s1449_s30 = smov 0   ;;  %s1451_s10 = smov 0  }
   0x3   :  { %s1453_s11 = smov 0   ;;  %s1455_s12 = smov 0  }
   0x4 LB: > { %s1470_s13 = sadd.s32 4294967295, %s1385_s12   ;;  %s989_s14 = sadd.s32 4294967294, %s1385_s12   ;;  %s1385_s12 = sphi %s1455_s12, %s1847_s12   ;;  %s1381_s11 = sphi %s1453_s11, %s1846_s11   ;;  %s1377_s10 = sphi %s1451_s10, %s1845_s10   ;;  %s1373_s30 = sphi %s1449_s30, %s1844_s30  }
   0x5   : > { %s1474_s15 = sadd.s32 1, %s1385_s12   ;;  %s224_s16 = sadd.s32 1, %s1381_s11 }
   0x6   : > { %s221_s17 = ssub.s32 %s1385_s12, %s1474_s15  ;;  %p234_p0 = scmp.ne.s32.totalorder %s1381_s11, %s1377_s10 }
   0x7   : > { %p222_p1 = scmp.eq.s32.totalorder %s221_s17, 0  ;;  %p235_p2 = scmp.eq.s32.totalorder %s1470_s13, 2 }
   0x8   : > { %p240_p3 = scmp.ne.s32.totalorder %s1377_s10, %s1373_s30  ;;  %p241_p4 = scmp.eq.s32.totalorder %s989_s14, 2 }
   0x9   : > { %s1485_s18 = scalar_select %p222_p1, %s1381_s11, %s224_s16  }
   0xa   : > { %p1487_p5 = por %p235_p2, %p234_p0  ;;  %p1491_p6 = por %p241_p4, %p240_p3 }
   0xb   : > { %p990_p7 = scmp.ge.s32.totalorder %s1385_s12, 1  ;;  %p248_p8 = scmp.lt.s32.totalorder %s1385_s12, 4 }
   0xc   : > { %s1841_s20 = scalar_select %p1491_p6, 1, 0 }
   0xd   : > { %p1243_p9 = scmp.eq.s32.totalorder %s1470_s13, 0  ;;  %p1498_p10 = pnand %p990_p7, %p248_p8 }
   0xe   : > { %s1387_s22 = smov [#allocation2]  }
   0xf   : > { %s278_s23 = sshll.u32 %s1387_s22, 4  ;;  %p1235_p11 = pneg %p1498_p10  ;;  %s279_s23 = int_to_ptr.vmem [resolvable:$true] %s278_s23 }
  0x10   : > { %s1306_s24 = scalar_lea.vmem %s279_s23, 2048  ;;  %p1314_p3 = scmp.lt.s32.totalorder %s279_s23, %s279_s23 }
  0x11   : > { %p1236_p12 = pnand %p1243_p9, %p1235_p11  ;;  %p1307_p0 = scmp.ne.s32.totalorder %s279_s23, %s1306_s24 }
  0x12   : > { %p1315_p4 = scmp.lt.s32.totalorder %s1306_s24, %s1306_s24 }
  0x13   : > { %p1297_p13 = pneg %p1236_p12 }
  0x14   : > { %p1316_p6 = por %p1315_p4, %p1314_p3 }
  0x15   : > { %p1309_p1 = pnand %p1307_p0, %p1297_p13 }
  0x17   : > { %p1310_p2 = pneg %p1309_p1 }
  0x19   : > { %p1317_p7 = pnand %p1316_p6, %p1310_p2 }
  0x1b   : > { %1320 = shalt.err (!%p1317_p7)
}
  0x1c   : > { %s1388_s25 = smov 128   ;;  %s1389_s26 = smov 8  }
  0x1d   : > { %1238 = dma.hbm_to_vmem [thread:$0]  (!%p1236_p12), %s1837_s7, 2048, %s279_s23, [#allocation3], %s1388_s25, %s1388_s25, %s1389_s26  }
  0x1e   : > { %304 = sbr.rel (%p1498_p10) target bundleno = 1137 (0x471), region = 56 }
  0x23   : > { %1364 = dma.done.wait (%p1243_p9), [#allocation3], 2048  }
  0x24   : > { %1366 = vsyncadd (%p1243_p9), [#allocation3], 4294965248  ;;  %p339_p8 = scmp.lt.s32.totalorder %s1470_s13, 2  ;;  %v1390_v0 = vmov 0.0   ;;  %vm1391_vm0 = vmmov 0   ;;  %vm352_vm1 = vcmask 64512  }
  0x25   : > { %1080 = vmatprep.subr.mxu0 %v1390_v0  ;;  %1082 = vmatprep.mubr.msk.f32.mxu0 %vm1391_vm0, %v1390_v0  ;;  %v344_v1 = vld [vmem:[%s1831_s1] sm:$0xff]  ;;  %v561_v3 = vld [vmem:[%s1833_s3 + $0x78] sm:$0xff]  ;;  %v560_v4 = vld [vmem:[%s1833_s3 + $0x70] sm:$0xff]  ;;  %v1392_v47 = vmov 683565275   ;;  %s336_s24 = sand.u32 1, %s1377_s10  }
  0x26   : > { %s340_s29 = scalar_select %p339_p8, %s1470_s13, 2  ;;  %1085 = vmatprep.subr.mxu1 %v1390_v0  ;;  %1117 = vmatprep.mubr.msk.f32.mxu1 %vm1391_vm0, %v1390_v0  ;;  %v559_v5 = vld [vmem:[%s1833_s3 + $0x68] sm:$0xff]  ;;  %v558_v6 = vld [vmem:[%s1833_s3 + $0x60] sm:$0xff]  ;;  %v557_v7 = vld [vmem:[%s1833_s3 + $0x58] sm:$0xff]  ;;  %v1393_v49 = vmov 2475754826  }
  0x27   : > { %1081 = vmatpush3.msra.mxu0 %v344_v1  ;;  %1086 = vmatpush3.msra.mxu1 %v561_v3  ;;  %v556_v8 = vld [vmem:[%s1833_s3 + $0x50] sm:$0xff]  ;;  %v555_v9 = vld [vmem:[%s1833_s3 + $0x48] sm:$0xff]  ;;  %v554_v10 = vld [vmem:[%s1833_s3 + $0x40] sm:$0xff]  ;;  %v1394_v52 = vmov 2131351028   ;;  %s995_s25 = sshll.u32 %s336_s24, 3 }
  0x28   : > { %s996_s14 = sshll.u32 %s340_s29, 3  ;;  %1120 = vmatprep.subr.mxu0 %v1390_v0  ;;  %1087 = vmatprep.subr.mxu1 %v1390_v0  ;;  %v553_v11 = vld [vmem:[%s1833_s3 + $0x38] sm:$0xff]  ;;  %v552_v12 = vld [vmem:[%s1833_s3 + $0x30] sm:$0xff]  ;;  %v551_v13 = vld [vmem:[%s1833_s3 + $0x28] sm:$0xff]  ;;  %v1395_v55 = vmov 2102212464  }
  0x29   : > { %s342_s21 = scalar_lea.vmem %s1830_s0, %s996_s14  ;;  %1088 = vmatpush3.msra.mxu1 %v560_v4  ;;  %v550_v14 = vld [vmem:[%s1833_s3 + $0x20] sm:$0xff]  ;;  %v549_v15 = vld [vmem:[%s1833_s3 + $0x18] sm:$0xff]  ;;  %v548_v16 = vld [vmem:[%s1833_s3 + $0x10] sm:$0xff]  ;;  %v1396_v58 = vmov 920167782   ;;  %s1007_s26 = sshll.u32 %s1470_s13, 7 }
  0x2a   : > { %v343_v2 = vld [vmem:[%s342_s21] sm:$0xff]  ;;  %1089 = vmatprep.subr.mxu1 %v1390_v0  ;;  %v547_v17 = vld [vmem:[%s1833_s3 + $0x8] sm:$0xff]  ;;  %v1596_v19 = vld [vmem:[#allocation2 + $0x78] sm:$0xff]  ;;  %v1397_v61 = vmov 1326507024   ;;  %s338_s27 = scalar_lea.vmem [#allocation5], %s995_s25  ;;  %s1789_s16 = scalar_lea.hbm %s1839_s9, %s1007_s26 }
  0x2b   : > { %1083 = vmatmul.mubr.msk.f32.vlgmr.msra.gmra.mxu0 %vm352_vm1, %v343_v2  ;;  %1090 = vmatpush3.msra.mxu1 %v559_v5  ;;  %v546_v18 = vld [vmem:[%s1833_s3] sm:$0xff]  ;;  %v1598_v20 = vld [vmem:[#allocation2 + $0x70] sm:$0xff]  ;;  %v1602_v21 = vld [vmem:[#allocation2 + $0x68] sm:$0xff]  ;;  %s918_s28 = sshll.u32 %s338_s27, 4  ;;  %s905_s17 = scalar_lea.sflag [#allocation4], %s336_s24  ;;  %s1791_s28 = int_to_ptr.vmem [resolvable:$true] %s918_s28 }
  0x2c   : > { %1152 = vmatprep.mubr.msk.f32.mxu0 %vm1391_vm0, %v1390_v0  ;;  %1091 = vmatprep.subr.mxu1 %v1390_v0  ;;  %v1606_v22 = vld [vmem:[#allocation2 + $0x60] sm:$0xff]  ;;  %v1610_v23 = vld [vmem:[#allocation2 + $0x58] sm:$0xff]  ;;  %v1614_v24 = vld [vmem:[#allocation2 + $0x50] sm:$0xff]  ;;  %s1321_s21 = scalar_lea.vmem %s1791_s28, 128  ;;  %s1398_s13 = smov [#allocation5]  }
  0x2d   : > { %1092 = vmatpush3.msra.mxu1 %v558_v6  ;;  %1121 = vmatpush3.msra.mxu0 %v1596_v19  ;;  %v1618_v25 = vld [vmem:[#allocation2 + $0x48] sm:$0xff]  ;;  %v1622_v26 = vld [vmem:[#allocation2 + $0x40] sm:$0xff]  ;;  %v1626_v27 = vld [vmem:[#allocation2 + $0x38] sm:$0xff]  ;;  %p1322_p6 = scmp.ne.s32.totalorder %s1791_s28, %s1321_s21  ;;  %s1325_s22 = sshll.u32 %s1398_s13, 4  ;;  %s1326_s22 = int_to_ptr.vmem [resolvable:$false] %s1325_s22 }
  0x2e   : > { %1093 = vmatprep.subr.mxu1 %v1390_v0  ;;  %1122 = vmatprep.subr.mxu0 %v1390_v0  ;;  %v1630_v28 = vld [vmem:[#allocation2 + $0x30] sm:$0xff]  ;;  %v1634_v29 = vld [vmem:[#allocation2 + $0x28] sm:$0xff]  ;;  %v1638_v30 = vld [vmem:[#allocation2 + $0x20] sm:$0xff]  ;;  %s1327_s23 = scalar_lea.vmem %s1326_s22, 256  ;;  %p1328_p11 = scmp.lt.s32.totalorder %s1791_s28, %s1326_s22 }
  0x2f   : > { %1094 = vmatpush3.msra.mxu1 %v557_v7  ;;  %1123 = vmatpush3.msra.mxu0 %v1598_v20  ;;  %v1642_v31 = vld [vmem:[#allocation2 + $0x18] sm:$0xff]  ;;  %v1646_v32 = vld [vmem:[#allocation2 + $0x10] sm:$0xff]  ;;  %v997_v33 = vld [vmem:[%s1832_s2] ss:$0 sm:$0xff]  ;;  %p1323_p9 = pnand %p1322_p6, %p1487_p5  ;;  %p1329_p12 = scmp.lt.s32.totalorder %s1327_s23, %s1321_s21 }
  0x30   : > { %1095 = vmatprep.subr.mxu1 %v1390_v0  ;;  %1124 = vmatprep.subr.mxu0 %v1390_v0 }
  0x31   : > { %1096 = vmatpush3.msra.mxu1 %v556_v8  ;;  %1125 = vmatpush3.msra.mxu0 %v1602_v21  ;;  %p1324_p10 = pneg %p1323_p9  ;;  %p1330_p13 = por %p1329_p12, %p1328_p11 }
  0x32   : > { %1097 = vmatprep.subr.mxu1 %v1390_v0  ;;  %1126 = vmatprep.subr.mxu0 %v1390_v0 }
  0x33   : > { %1098 = vmatpush3.msra.mxu1 %v555_v9  ;;  %1127 = vmatpush3.msra.mxu0 %v1606_v22  ;;  %p1331_p0 = pnand %p1330_p13, %p1324_p10 }
  0x34   : > { %1099 = vmatprep.subr.mxu1 %v1390_v0  ;;  %1128 = vmatprep.subr.mxu0 %v1390_v0 }
  0x35   : > { %1100 = vmatpush3.msra.mxu1 %v554_v10  ;;  %1129 = vmatpush3.msra.mxu0 %v1610_v23 }
  0x36   : > { %1101 = vmatprep.subr.mxu1 %v1390_v0  ;;  %1130 = vmatprep.subr.mxu0 %v1390_v0 }
  0x37   : > { %1102 = vmatpush3.msra.mxu1 %v553_v11  ;;  %1131 = vmatpush3.msra.mxu0 %v1614_v24 }
  0x38   : > { %1103 = vmatprep.subr.mxu1 %v1390_v0  ;;  %1132 = vmatprep.subr.mxu0 %v1390_v0 }
  0x39   : > { %1104 = vmatpush3.msra.mxu1 %v552_v12  ;;  %1133 = vmatpush3.msra.mxu0 %v1618_v25 }
  0x3a   : > { %1105 = vmatprep.subr.mxu1 %v1390_v0  ;;  %1134 = vmatprep.subr.mxu0 %v1390_v0 }
  0x3b   : > { %1106 = vmatpush3.msra.mxu1 %v551_v13  ;;  %1135 = vmatpush3.msra.mxu0 %v1622_v26 }
  0x3c   : > { %1107 = vmatprep.subr.mxu1 %v1390_v0  ;;  %1136 = vmatprep.subr.mxu0 %v1390_v0 }
  0x3d   : > { %1108 = vmatpush3.msra.mxu1 %v550_v14  ;;  %1137 = vmatpush3.msra.mxu0 %v1626_v27 }
  0x3e   : > { %1109 = vmatprep.subr.mxu1 %v1390_v0  ;;  %1138 = vmatprep.subr.mxu0 %v1390_v0 }
  0x3f   : > { %1110 = vmatpush3.msra.mxu1 %v549_v15  ;;  %1139 = vmatpush3.msra.mxu0 %v1630_v28 }
  0x40   : > { %1111 = vmatprep.subr.mxu1 %v1390_v0  ;;  %1140 = vmatprep.subr.mxu0 %v1390_v0 }
  0x41   : > { %1112 = vmatpush3.msra.mxu1 %v548_v16  ;;  %1141 = vmatpush3.msra.mxu0 %v1634_v29 }
  0x42   : > { %1113 = vmatprep.subr.mxu1 %v1390_v0  ;;  %1142 = vmatprep.subr.mxu0 %v1390_v0 }
  0x43   : > { %1114 = vmatpush3.msra.mxu1 %v547_v17  ;;  %1143 = vmatpush3.msra.mxu0 %v1638_v30 }
  0x44   : > { %1115 = vmatprep.subr.mxu1 %v1390_v0  ;;  %1144 = vmatprep.subr.mxu0 %v1390_v0 }
  0x45   : > { %1116 = vmatpush3.msra.mxu1 %v546_v18  ;;  %1145 = vmatpush3.msra.mxu0 %v1642_v31 }
  0x46   : > { %1155 = vmatprep.subr.mxu1 %v1390_v0  ;;  %1146 = vmatprep.subr.mxu0 %v1390_v0 }
  0x47   : > { %1147 = vmatpush3.msra.mxu0 %v1646_v32 }
  0x48   : > { %1148 = vmatprep.subr.mxu0 %v1390_v0 }
  0xeb   : > { %v422_v34 = vpop.f32.mrf.mxu0 }
  0xec   : > { %v1655_v35 = vadd.f32 %v997_v33, %v422_v34 }
  0xed   : > { %v1084_v36 = vpop.f32.mrf.mxu0 }
  0xee   : > { %v444_v37 = vand.u32 2139095040, %v1655_v35  ;;  %v441_v41 = vand.u32 2147483647, %v1655_v35  ;;  %vm443_vm9 = vcmp.lt.s32.totalorder %v1655_v35, 0  ;;  %vm533_vm15 = vweird.f32 %v1655_v35 }
  0xf0   : > { %v445_v38 = vshrl.u32 %v444_v37, 23  ;;  %v448_v45 = vand.u32 8388607, %v441_v41  ;;  %vm442_vm10 = vcmp.le.f32.partialorder %v441_v41, 0.7853982 }
  0xf2   : > { %v999_v39 = vadd.s32 4294967169, %v445_v38  ;;  %v449_v63 = vor.u32 8388608, %v448_v45 }
  0xf4   : > { %v451_v40 = vadd.s32 1, %v999_v39  ;;  %v489_v14 = vshll.u32 %v449_v63, 8 }
  0xf6   : > { %vm452_vm2 = vcmp.gt.s32.totalorder %v451_v40, 0 }
  0xf7   : > { %v453_v42 = vsel %vm452_vm2, %v451_v40, 0 }
  0xf8   : > { %v455_v43 = vand.u32 31, %v453_v42  ;;  %v454_v46 = vshrl.u32 %v453_v42, 5 }
  0xfa   : > { %v456_v44 = vsub.s32 32, %v455_v43  ;;  %v458_v48 = vshll.u32 %v1392_v47, %v455_v43  ;;  %v461_v50 = vshll.u32 %v1393_v49, %v455_v43  ;;  %v464_v54 = vshll.u32 %v1394_v52, %v455_v43 }
  0xfb   : > { %v467_v57 = vshll.u32 %v1395_v55, %v455_v43  ;;  %v470_v60 = vshll.u32 %v1396_v58, %v455_v43  ;;  %vm473_vm3 = vcmp.lt.s32.totalorder %v454_v46, 1  ;;  %vm476_vm4 = vcmp.lt.s32.totalorder %v454_v46, 4 }
  0xfc   : > { %v459_v51 = vshrl.u32 %v1393_v49, %v456_v44  ;;  %v462_v53 = vshrl.u32 %v1394_v52, %v456_v44  ;;  %v465_v56 = vshrl.u32 %v1395_v55, %v456_v44  ;;  %v468_v59 = vshrl.u32 %v1396_v58, %v456_v44 }
  0xfd   : > { %v471_v62 = vshrl.u32 %v1397_v61, %v456_v44  ;;  %v457_v9 = vshrl.u32 %v1392_v47, %v456_v44  ;;  %vm475_vm5 = vcmp.lt.s32.totalorder %v454_v46, 3  ;;  %vm474_vm6 = vcmp.lt.s32.totalorder %v454_v46, 2 }
  0xfe   : > { %v460_v1 = vor.u32 %v459_v51, %v458_v48  ;;  %v463_v2 = vor.u32 %v462_v53, %v461_v50  ;;  %v466_v3 = vor.u32 %v465_v56, %v464_v54  ;;  %v469_v4 = vor.u32 %v468_v59, %v467_v57 }
  0xff   : > { %v472_v5 = vor.u32 %v471_v62, %v470_v60 }
 0x100   : > { %v478_v6 = vsel %vm476_vm4, %v466_v3, 2102212464  ;;  %v481_v7 = vsel %vm473_vm3, %v460_v1, %v463_v2  ;;  %v485_v8 = vsel %vm473_vm3, %v463_v2, %v466_v3  ;;  %v482_v10 = vsel %vm476_vm4, %v469_v4, 920167782 }
 0x101   : > { %v486_v11 = vsel %vm476_vm4, %v472_v5, 1326507024  ;;  %v483_v12 = vsel %vm475_vm5, %v466_v3, %v482_v10  ;;  %v477_v15 = vsel %vm473_vm3, %v457_v9, %v460_v1  ;;  %v479_v16 = vsel %vm475_vm5, %v463_v2, %v478_v6 }
 0x102   : > { %v487_v13 = vsel %vm475_vm5, %v469_v4, %v486_v11  ;;  %v484_v17 = vsel %vm474_vm6, %v481_v7, %v483_v12  ;;  %v480_v38 = vsel %vm474_vm6, %v477_v15, %v479_v16 }
 0x103   : > { %v488_v18 = vsel %vm474_vm6, %v485_v8, %v487_v13  ;;  %v1664_v36 = vmul.u32.u64.low %v489_v14, %v484_v17  ;;  %v1665_v37 = vmul.u32.u64.high %v489_v14, %v484_v17, %v1664_v36  ;;  %v496_v40 = vmul.u32 %v489_v14, %v480_v38  ;;  %v824_v38 = vld [vmem:[%s1838_s8 + $0x40] sm:$0xff] }
 0x104   : > { %v1661_v33 = vmul.u32.u64.low %v489_v14, %v488_v18  ;;  %v1662_v34 = vmul.u32.u64.high %v489_v14, %v488_v18, %v1661_v33  ;;  %v426_v8 = vlaneseq }
 0x105   : > { %v499_v39 = vadd.s32 1, %v1665_v37 }
 0x106   : > { %vm498_vm7 = vc.u32 %v1662_v34, %v1664_v36  ;;  %v497_v53 = vadd.s32 %v1664_v36, %v1662_v34  ;;  %v427_v10 = vand.u32 127, %v426_v8  ;;  %v826_v36 = vld [vmem:[%s1838_s8 + $0x50] sm:$0xff] }
 0x107   : > { %v500_v42 = vsel %vm498_vm7, %v499_v39, %v1665_v37  ;;  %v825_v37 = vld [vmem:[%s1838_s8 + $0x48] sm:$0xff]  ;;  %v823_v39 = vld [vmem:[%s1838_s8 + $0x38] sm:$0xff] }
 0x108   : > { %v501_v43 = vadd.s32 %v500_v42, %v496_v40  ;;  %v432_v13 = vand.u32 31, %v427_v10  ;;  %v822_v40 = vld [vmem:[%s1838_s8 + $0x30] sm:$0xff]  ;;  %v821_v42 = vld [vmem:[%s1838_s8 + $0x28] sm:$0xff] }
 0x10a   : > { %v502_v44 = vadd.s32 536870912, %v501_v43  ;;  %vm440_vm13 = vcmp.ne.s32.totalorder %v432_v13, 31 }
 0x10c   : > { %v503_v45 = vshrl.u32 %v502_v44, 30  ;;  %v819_v44 = vld [vmem:[%s1838_s8 + $0x18] sm:$0xff] }
 0x10e   : > { %v504_v46 = vshll.u32 %v503_v45, 30  ;;  %v527_v3 = vsub.s32 4, %v503_v45 }
 0x110   : > { %v505_v47 = vsub.s32 %v501_v43, %v504_v46  ;;  %v528_v6 = vsel %vm443_vm9, %v527_v3, %v503_v45  ;;  %v820_v43 = vld [vmem:[%s1838_s8 + $0x20] sm:$0xff]  ;;  %v818_v45 = vld [vmem:[%s1838_s8 + $0x10] sm:$0xff]  ;;  %v817_v46 = vld [vmem:[%s1838_s8 + $0x8] sm:$0xff] }
 0x111   : > { %v530_v7 = vsel %vm442_vm10, 0, %v528_v6 }
 0x112   : > { %v507_v48 = vsub.s32 0, %v505_v47  ;;  %v534_v9 = vadd.s32 3, %v530_v7 }
 0x114   : > { %v1000_v49 = vmin.u32 %v507_v48, %v505_v47  ;;  %v535_v11 = vand.u32 3, %v534_v9 }
 0x116   : > { %v509_v50 = vclz %v1000_v49  ;;  %vm540_vm11 = vcmp.eq.s32.totalorder %v535_v11, 2  ;;  %vm537_vm12 = vcmp.eq.s32.totalorder %v535_v11, 0  ;;  %vm536_vm14 = vcmp.lt.s32.totalorder %v535_v11, 2 }
 0x118   : > { %v1001_v51 = vadd.s32 4294967294, %v509_v50 }
 0x11a   : > { %vm1002_vm8 = vcmp.lt.s32.totalorder %v1001_v51, 0 }
 0x11b   : > { %v512_v52 = vsel %vm1002_vm8, 0, %v1001_v51 }
 0x11c   : > { %v513_v54 = vsub.s32 32, %v512_v52  ;;  %v517_v55 = vsub.s32 4294967266, %v512_v52  ;;  %v514_v56 = vshll.u32 %v505_v47, %v512_v52  ;;  %v816_v47 = vld [vmem:[%s1838_s8] sm:$0xff] }
 0x11d   : > { %v1004_v52 = vld [vmem:[%s1835_s5] ss:$0 sm:$0xff] }
 0x11e   : > { %v515_v57 = vshrl.u32 %v497_v53, %v513_v54  ;;  %v518_v58 = vadd.s32 127, %v517_v55  ;;  %v1005_v54 = vld [vmem:[%s1836_s6] ss:$0 sm:$0xff] }
 0x120   : > { %v516_v59 = vor.u32 %v515_v57, %v514_v56  ;;  %v519_v60 = vshll.u32 %v518_v58, 23 }
 0x122   : > { %v520_v61 = vor.u32 4788187, %v519_v60  ;;  %v523_v63 = vcvt.s32.f32 %v516_v59 }
 0x124   : > { %v521_v62 = vand.u32 2147483647, %v520_v61 }
 0x126   : > { %v524_v1 = vmul.f32 %v523_v63, %v521_v62 }
 0x128   : > { %v525_v2 = vxor.u32 2147483648, %v524_v1 }
 0x12a   : > { %v526_v4 = vsel %vm443_vm9, %v525_v2, %v524_v1 }
 0x12b   : > { %v529_v5 = vsel %vm442_vm10, %v1655_v35, %v526_v4 }
 0x12c   : > { %1289 = vcosq.f32 %v529_v5 }
 0x12d   : > { %1291 = vsinq.f32 %v529_v5 }
 0x139   : > { %v1290_v12 = vpop.eup %1289 }
 0x13a   : > { %v1292_v14 = vpop.eup %1291  ;;  %v541_v15 = vxor.u32 2147483648, %v1290_v12 }
 0x13b   : > { %v538_v16 = vxor.u32 2147483648, %v1292_v14 }
 0x13c   : > { %v542_v17 = vsel %vm540_vm11, %v541_v15, %v1292_v14 }
 0x13d   : > { %v539_v41 = vsel %vm537_vm12, %v1290_v12, %v538_v16 }
 0x13e   : > { %v543_v18 = vsel %vm536_vm14, %v539_v41, %v542_v17 }
 0x13f   : > { %v544_v33 = vsel %vm533_vm15, nan, %v543_v18 }
 0x140   : > { %v545_v34 = vsel %vm440_vm13, %v544_v33, %v1655_v35  ;;  %v827_v35 = vld [vmem:[%s1838_s8 + $0x58] sm:$0xff] }
 0x141   : > { %1118 = vmatmul.mubr.f32.vlgmr.msra.gmra.mxu1 %v545_v34 }
 0x142   : > { %1156 = vmatpush3.msra.mxu1 %v1596_v19  ;;  %1187 = vmatprep.mubr.msk.f32.mxu1 %vm1391_vm0, %v1390_v0  ;;  %v640_v19 = vld [vmem:[#allocation2 + $0x8] sm:$0xff] }
 0x143   : > { %1157 = vmatprep.subr.mxu1 %v1390_v0  ;;  %1149 = vmatpush3.msra.mxu0 %v640_v19 }
 0x144   : > { %1158 = vmatpush3.msra.mxu1 %v1598_v20  ;;  %1150 = vmatprep.subr.mxu0 %v1390_v0  ;;  %v639_v20 = vld [vmem:[#allocation2] sm:$0xff] }
 0x145   : > { %1159 = vmatprep.subr.mxu1 %v1390_v0  ;;  %1151 = vmatpush3.msra.mxu0 %v639_v20 }
 0x146   : > { %1160 = vmatpush3.msra.mxu1 %v1602_v21  ;;  %1190 = vmatprep.subr.mxu0 %v1390_v0  ;;  %v1003_v21 = vld [vmem:[%s1834_s4] ss:$0 sm:$0xff] }
 0x147   : > { %1161 = vmatprep.subr.mxu1 %v1390_v0 }
 0x148   : > { %1162 = vmatpush3.msra.mxu1 %v1606_v22 }
 0x149   : > { %1163 = vmatprep.subr.mxu1 %v1390_v0 }
 0x14a   : > { %1164 = vmatpush3.msra.mxu1 %v1610_v23 }
 0x14b   : > { %1165 = vmatprep.subr.mxu1 %v1390_v0 }
 0x14c   : > { %1166 = vmatpush3.msra.mxu1 %v1614_v24 }
 0x14d   : > { %1167 = vmatprep.subr.mxu1 %v1390_v0 }
 0x14e   : > { %1168 = vmatpush3.msra.mxu1 %v1618_v25  ;;  %v831_v25 = vld [vmem:[%s1838_s8 + $0x78] sm:$0xff] }
 0x14f   : > { %1169 = vmatprep.subr.mxu1 %v1390_v0 }
 0x150   : > { %1170 = vmatpush3.msra.mxu1 %v1622_v26  ;;  %v830_v26 = vld [vmem:[%s1838_s8 + $0x70] sm:$0xff] }
 0x151   : > { %1171 = vmatprep.subr.mxu1 %v1390_v0 }
 0x152   : > { %1172 = vmatpush3.msra.mxu1 %v1626_v27  ;;  %v829_v27 = vld [vmem:[%s1838_s8 + $0x68] sm:$0xff] }
 0x153   : > { %1173 = vmatprep.subr.mxu1 %v1390_v0 }
 0x154   : > { %1174 = vmatpush3.msra.mxu1 %v1630_v28 }
 0x155   : > { %1175 = vmatprep.subr.mxu1 %v1390_v0 }
 0x156   : > { %1176 = vmatpush3.msra.mxu1 %v1634_v29 }
 0x157   : > { %1177 = vmatprep.subr.mxu1 %v1390_v0 }
 0x158   : > { %1178 = vmatpush3.msra.mxu1 %v1638_v30 }
 0x159   : > { %1179 = vmatprep.subr.mxu1 %v1390_v0 }
 0x15a   : > { %1180 = vmatpush3.msra.mxu1 %v1642_v31 }
 0x15b   : > { %1181 = vmatprep.subr.mxu1 %v1390_v0 }
 0x15c   : > { %1182 = vmatpush3.msra.mxu1 %v1646_v32  ;;  %v828_v32 = vld [vmem:[%s1838_s8 + $0x60] sm:$0xff] }
 0x15d   : > { %1183 = vmatprep.subr.mxu1 %v1390_v0 }
 0x15e   : > { %1184 = vmatpush3.msra.mxu1 %v640_v19 }
 0x15f   : > { %1185 = vmatprep.subr.mxu1 %v1390_v0 }
 0x160   : > { %1186 = vmatpush3.msra.mxu1 %v639_v20 }
 0x201   : > { %v635_v22 = vpop.f32.mrf.mxu1 }
 0x202   : > { %v636_v23 = vadd.f32 %v1003_v21, %v635_v22 }
 0x203   : > { %v1119_v24 = vpop.f32.mrf.mxu1 }
 0x204   : > { %1153 = vmatmul.mubr.f32.vlgmr.msra.gmra.mxu0 %v636_v23 }
 0x205   : > { %1222 = vmatprep.mubr.msk.f32.mxu0 %vm1391_vm0, %v1390_v0  ;;  %1191 = vmatpush3.msra.mxu0 %v831_v25  ;;  %vm902_vm0 = vcmask 261120  }
 0x206   : > { %1192 = vmatprep.subr.mxu0 %v1390_v0 }
 0x207   : > { %1193 = vmatpush3.msra.mxu0 %v830_v26 }
 0x208   : > { %1194 = vmatprep.subr.mxu0 %v1390_v0 }
 0x209   : > { %1195 = vmatpush3.msra.mxu0 %v829_v27 }
 0x20a   : > { %1196 = vmatprep.subr.mxu0 %v1390_v0 }
 0x20b   : > { %1197 = vmatpush3.msra.mxu0 %v828_v32 }
 0x20c   : > { %1198 = vmatprep.subr.mxu0 %v1390_v0 }
 0x20d   : > { %1199 = vmatpush3.msra.mxu0 %v827_v35 }
 0x20e   : > { %1200 = vmatprep.subr.mxu0 %v1390_v0 }
 0x20f   : > { %1201 = vmatpush3.msra.mxu0 %v826_v36 }
 0x210   : > { %1202 = vmatprep.subr.mxu0 %v1390_v0 }
 0x211   : > { %1203 = vmatpush3.msra.mxu0 %v825_v37 }
 0x212   : > { %1204 = vmatprep.subr.mxu0 %v1390_v0 }
 0x213   : > { %1205 = vmatpush3.msra.mxu0 %v824_v38 }
 0x214   : > { %1206 = vmatprep.subr.mxu0 %v1390_v0 }
 0x215   : > { %1207 = vmatpush3.msra.mxu0 %v823_v39 }
 0x216   : > { %1208 = vmatprep.subr.mxu0 %v1390_v0 }
 0x217   : > { %1209 = vmatpush3.msra.mxu0 %v822_v40 }
 0x218   : > { %1210 = vmatprep.subr.mxu0 %v1390_v0 }
 0x219   : > { %1211 = vmatpush3.msra.mxu0 %v821_v42 }
 0x21a   : > { %1212 = vmatprep.subr.mxu0 %v1390_v0 }
 0x21b   : > { %1213 = vmatpush3.msra.mxu0 %v820_v43 }
 0x21c   : > { %1214 = vmatprep.subr.mxu0 %v1390_v0 }
 0x21d   : > { %1215 = vmatpush3.msra.mxu0 %v819_v44 }
 0x21e   : > { %1216 = vmatprep.subr.mxu0 %v1390_v0 }
 0x21f   : > { %1217 = vmatpush3.msra.mxu0 %v818_v45 }
 0x220   : > { %1218 = vmatprep.subr.mxu0 %v1390_v0 }
 0x221   : > { %1219 = vmatpush3.msra.mxu0 %v817_v46 }
 0x222   : > { %1220 = vmatprep.subr.mxu0 %v1390_v0 }
 0x223   : > { %1221 = vmatpush3.msra.mxu0 %v816_v47 }
 0x2c4   : > { %v721_v28 = vpop.f32.mrf.mxu0 }
 0x2c5   : > { %v725_v29 = vsub.f32 %v636_v23, %v721_v28 }
 0x2c6   : > { %v1154_v30 = vpop.f32.mrf.mxu0 }
 0x2c7   : > { %v726_v31 = vmul.f32 %v725_v29, %v725_v29 }
 0x2c9   : > { %1188 = vmatmul.mubr.f32.vlgmr.msra.gmra.mxu1 %v726_v31 }
 0x389   : > { %v793_v48 = vpop.f32.mrf.mxu1 }
 0x38a   : > { %v794_v49 = vadd.f32 1e-05, %v793_v48 }
 0x38b   : > { %v1189_v50 = vpop.f32.mrf.mxu1 }
 0x38c   : > { %1293 = vrsqrt.f32 %v794_v49 }
 0x399   : > { %v1294_v51 = vpop.eup %1293 }
 0x39a   : > { %v798_v53 = vmul.f32 %v1294_v51, %v725_v29 }
 0x39c   : > { %v806_v55 = vmul.f32 %v1004_v52, %v798_v53 }
 0x39e   : > { %v814_v56 = vadd.f32 %v1005_v54, %v806_v55 }
 0x3a0   : > { %v815_v57 = vmax.f32 %v814_v56, 0.0 }
 0x3a2   : > { %1223 = vmatmul.mubr.f32.vlgmr.msra.gmra.mxu0 %v815_v57 }
 0x462   : > { %v898_v0 = vpop.f32.mrf.mxu0 }
 0x463   : > { %903 = vst.msk [vmem:[%s338_s27] sm:$0xff] %vm902_vm0, %v898_v0 }
 0x464   : > { %v1224_v58 = vpop.f32.mrf.mxu0 }
 0x465   : > { %1334 = shalt.err (!%p1331_p0)
}
 0x466   : > { %s1335_s25 = scalar_lea.hbm %s1789_s16, 128  ;;  %s1339_s27 = scalar_lea.hbm %s1839_s9, 384 }
 0x467   : > { %p1336_p1 = scmp.ne.s32.totalorder %s1789_s16, %s1335_s25  ;;  %p1340_p4 = scmp.lt.s32.totalorder %s1789_s16, %s1839_s9 }
 0x468   : > { %p1341_p7 = scmp.lt.s32.totalorder %s1339_s27, %s1335_s25 }
 0x469   : > { %p1337_p2 = pnand %p1336_p1, %p1487_p5 }
 0x46a   : > { %p1342_p8 = por %p1341_p7, %p1340_p4 }
 0x46b   : > { %p1338_p3 = pneg %p1337_p2 }
 0x46d   : > { %p1343_p6 = pnand %p1342_p8, %p1338_p3 }
 0x46f   : > { %1346 = shalt.err (!%p1343_p6)
}
 0x470   : > { %1233 = dma.vmem_to_hbm [thread:$0]  (%p1487_p5), %s1791_s28, 128, %s1789_s16, %s905_s17  }
 0x471 PF: > { %p1245_p9 = scmp.ge.s32.totalorder %s1385_s12, 2  ;;  %s930_s21 = sand.u32 1, %s1373_s30  }
 0x472   : > { %p1843_p10 = scmp.ne.s32.totalorder %s1841_s20, 0  ;;  %s931_s13 = scalar_lea.sflag [#allocation4], %s930_s21 }
 0x474   : > { %p1240_p11 = pnand %p1245_p9, %p1843_p10 }
 0x476   : > { %p1241_p12 = pneg %p1240_p11 }
 0x478   : > { %1368 = dma.done.wait (%p1241_p12), %s931_s13, 128  }
 0x479   : > { %1370 = vsyncadd (%p1241_p12), %s931_s13, 4294967168  ;;  %p20_p13 = scmp.ge.s32.totalorder %s1474_s15, 5   ;;  %s1844_s30 = smov %s1377_s10 }
 0x47a   : > { %s1845_s10 = smov %s1381_s11  ;;  %s1846_s11 = smov %s1485_s18 }
 0x47b   : > { %s1847_s12 = smov %s1474_s15  ;;  %22 = sbr.rel (!%p20_p13) target bundleno = 4 (0x4), region = 96 }
 0x480   :  { %936 = vsyncpa [#allocation3], 1 }
 0x481   :  { %938 = vsyncpa [#allocation3 + $0x1], 1 }
 0x482   :  { %939 = vsyncpa [#allocation4], 1 }
 0x483   :  { %941 = vsyncpa [#allocation4 + $0x1], 1 }

</bundles_post_ra>
